<compile_context>
chip_gen: v6e
topology: v6e:2x2x1
jax: 0.10.0
libtpu: 0.0.40
codegen_flags: <defaults>
</compile_context>

<pallas_src>
import math

import jax
import jax.numpy as jnp
from jax.experimental import pallas as pl
from jax.experimental.pallas import tpu as pltpu


def _round_up(x, m):
    return (x + m - 1) // m * m


def _pick_tile(dim, target, align):
    """Largest multiple of `align` <= min(target, aligned_dim) that divides
    the aligned dim (avoids zero-pad work for awkward hidden sizes)."""
    dim_al = _round_up(dim, align)
    cap = max(align, min(target, dim_al))
    best = align
    t = align
    while t <= cap:
        if dim_al % t == 0:
            best = t
        t += align
    return best, dim_al


# ----------------------------- kernels ------------------------------------


def _fullk_kernel(x_ref, wt_ref, b_ref, o_ref):
    # x_ref : (tm, K)  bf16/f32 activations (full-K panel)
    # wt_ref: (K, tn)  weight panel, already [K, N]
    # b_ref : (1, tn)  f32 bias (+ steering vector when the hook is enabled)
    acc = jax.lax.dot_general(
        x_ref[...], wt_ref[...],
        dimension_numbers=(((1,), (0,)), ((), ())),
        preferred_element_type=jnp.float32,
    )
    o_ref[...] = (acc + b_ref[...]).astype(o_ref.dtype)


def _ktiled_accout_kernel(x_ref, wt_ref, b_ref, o_ref):
    # f32 output block is resident across the K grid axis -> accumulate
    # directly into o_ref (no VMEM scratch, no epilogue copy).
    k = pl.program_id(2)

    @pl.when(k == 0)
    def _():
        o_ref[...] = jnp.zeros_like(o_ref)

    o_ref[...] += jax.lax.dot_general(
        x_ref[...], wt_ref[...],
        dimension_numbers=(((1,), (0,)), ((), ())),
        preferred_element_type=jnp.float32,
    )

    @pl.when(k == pl.num_programs(2) - 1)
    def _():
        o_ref[...] += b_ref[...]


def _ktiled_scratch_kernel(x_ref, wt_ref, b_ref, o_ref, acc_ref):
    # Narrow output dtype: keep an f32 accumulator scratch, cast once.
    k = pl.program_id(2)

    @pl.when(k == 0)
    def _():
        acc_ref[...] = jnp.zeros_like(acc_ref)

    acc_ref[...] += jax.lax.dot_general(
        x_ref[...], wt_ref[...],
        dimension_numbers=(((1,), (0,)), ((), ())),
        preferred_element_type=jnp.float32,
    )

    @pl.when(k == pl.num_programs(2) - 1)
    def _():
        o_ref[...] = (acc_ref[...] + b_ref[...]).astype(o_ref.dtype)


# ----------------------------- wrapper -------------------------------------


def make_hooked_linear(weight, bias, steer_vec, *, enabled=True,
                       compute_dtype=jnp.bfloat16,
                       tm_target=512, tn_target=512, tk_target=1024,
                       max_fullk_vmem_bytes=24 * 1024 * 1024):
    """CustomHook(nn.Linear(H_in, H_out), hook_fn=lambda t: t + steer_vec).

    All parameter prep (hook fold, transpose to [K, N], padding, bf16 cast)
    happens ONCE here; the returned jitted forward(x) only reshapes/casts x
    and launches the Pallas kernel.
    """
    H_out, H_in = weight.shape
    compute_dtype = jnp.dtype(compute_dtype)
    csize = compute_dtype.itemsize
    pack = {1: 32, 2: 16, 4: 8}.get(csize, 8)   # sublane packing factor

    # CustomHook.forward enabled branch: fold the hook's steering vector into
    # the bias (free host-side precompute).  Disabled branch: plain bias.
    b_eff = bias + steer_vec if enabled else bias

    # N tiling (output / weight minor dim), K tiling only if needed.
    tn, Np = _pick_tile(H_out, tn_target, 128)
    tk, Kp = _pick_tile(H_in, tk_target, 128)

    # Full-K panels if they fit a conservative double-buffered VMEM budget.
    est_fullk = (2 * (tm_target * H_in + H_in * tn) * csize
                 + 2 * tm_target * tn * 4 + 2 * tn * 4)
    use_fullk = est_fullk <= max_fullk_vmem_bytes
    if use_fullk:
        tk, Kp = H_in, H_in            # full-K blocks need no K padding at all

    # One-time weight prep: transpose to MXU-native [K, N], pad, cast.
    wt = weight.T
    if (Kp, Np) != (H_in, H_out):
        wt = jnp.pad(wt, ((0, Kp - H_in), (0, Np - H_out)))
    wt = jnp.asarray(wt, compute_dtype)
    b2d = jnp.asarray(b_eff, jnp.float32).reshape(1, H_out)
    if Np != H_out:
        b2d = jnp.pad(b2d, ((0, 0), (0, Np - H_out)))

    @jax.jit
    def forward(x):
        assert x.shape[-1] == H_in
        lead = x.shape[:-1]
        M = math.prod(lead)
        out_dtype = x.dtype

        x2d = x.reshape(M, H_in).astype(compute_dtype)
        if Kp != H_in:                              # K-tiled fallback only
            x2d = jnp.pad(x2d, ((0, 0), (0, Kp - H_in)))

        # M tiling: NO M padding; Pallas masks writes of the ragged last block.
        tm = max(pack, (min(tm_target, _round_up(M, pack)) // pack) * pack)
        grid_m = -(-M // tm)

        # Try to keep >=2 blocks on the parallel axes so both v7x TensorCores
        # get work even at decode-sized M.
        tn_eff = tn
        if grid_m == 1 and Np // tn_eff == 1 and Np >= 256:
            for cand in range(_round_up(Np // 2, 128), 127, -128):
                if Np % cand == 0:
                    tn_eff = cand
                    break
        grid_n = Np // tn_eff

        osize = jnp.dtype(out_dtype).itemsize
        kblk = Kp if use_fullk else tk
        vmem_est = (2 * (tm * kblk + kblk * tn_eff) * csize
                    + 2 * tm * tn_eff * osize + 2 * tn_eff * 4
                    + (tm * tn_eff * 4 if out_dtype != jnp.float32 else 0))
        vmem_limit = None
        if vmem_est > 12 * 1024 * 1024:
            vmem_limit = min(2 * vmem_est, 96 * 1024 * 1024)

        cost = pl.CostEstimate(
            flops=2 * M * H_in * H_out,
            transcendentals=0,
            bytes_accessed=(x2d.size * csize + wt.size * csize
                            + b2d.size * 4 + M * Np * osize),
        )

        if use_fullk:
            grid = (grid_m, grid_n)
            in_specs = [
                pl.BlockSpec((tm, Kp), lambda i, j: (i, 0)),       # x panel
                pl.BlockSpec((Kp, tn_eff), lambda i, j: (0, j)),   # W^T panel
                pl.BlockSpec((1, tn_eff), lambda i, j: (0, j)),    # bias(+steer)
            ]
            out_specs = pl.BlockSpec((tm, tn_eff), lambda i, j: (i, j))
            kernel = _fullk_kernel
            scratch = []
            dim_sem = ("parallel", "parallel")
        else:
            grid = (grid_m, grid_n, Kp // tk)
            in_specs = [
                pl.BlockSpec((tm, tk), lambda i, j, k: (i, k)),
                pl.BlockSpec((tk, tn_eff), lambda i, j, k: (k, j)),
                pl.BlockSpec((1, tn_eff), lambda i, j, k: (0, j)),
            ]
            out_specs = pl.BlockSpec((tm, tn_eff), lambda i, j, k: (i, j))
            dim_sem = ("parallel", "parallel", "arbitrary")
            if out_dtype == jnp.float32:
                kernel = _ktiled_accout_kernel     # accumulate straight into o_ref
                scratch = []
            else:
                kernel = _ktiled_scratch_kernel    # f32 scratch, cast in epilogue
                scratch = [pltpu.VMEM((tm, tn_eff), jnp.float32)]

        out2d = pl.pallas_call(
            kernel,
            out_shape=jax.ShapeDtypeStruct((M, Np), out_dtype),
            grid_spec=pltpu.PrefetchScalarGridSpec(
                num_scalar_prefetch=0,
                grid=grid,
                in_specs=in_specs,
                out_specs=out_specs,
                scratch_shapes=scratch,
            ),
            compiler_params=pltpu.CompilerParams(
                dimension_semantics=dim_sem,
                vmem_limit_bytes=vmem_limit,
            ),
            cost_estimate=cost,
        )(x2d, wt, b2d)

        return out2d[:, :H_out].reshape(*lead, H_out)

    return forward


# TODO(synk): the tuple-output branch of CustomHook.forward (hook applied only
# to element 0 of a tuple) and runtime toggling of `enabled` are plain Python
# control flow around the wrapped module; here `enabled` is baked at factory
# time and the wrapped nn.Linear returns a single tensor.


if __name__ == "__main__":
    key = jax.random.PRNGKey(0)
    kx, kw, kb, ks, kx2, kw2, kb2, ks2 = jax.random.split(key, 8)

    # ---- Test 1: demo shape -> full-K single-dot path (bf16 MXU operands) --
    B, S, H = 2, 8, 32
    x = jax.random.normal(kx, (B, S, H), dtype=jnp.float32)
    weight = jax.random.normal(kw, (H, H), dtype=jnp.float32) * 0.05
    bias = jax.random.normal(kb, (H,), dtype=jnp.float32) * 0.01
    steer = jax.random.normal(ks, (H,), dtype=jnp.float32) * 0.1

    fwd = make_hooked_linear(weight, bias, steer, enabled=True)
    out = jax.block_until_ready(fwd(x))

    # Reference with the same bf16-rounded operands (f32 accumulation).
    xb = x.astype(jnp.bfloat16).astype(jnp.float32).reshape(-1, H)
    wb = weight.astype(jnp.bfloat16).astype(jnp.float32)
    ref = (jnp.dot(xb, wb.T, precision=jax.lax.Precision.HIGHEST)
           + bias + steer).reshape(B, S, H)
    assert out.shape == (B, S, H)
    assert jnp.allclose(out, ref, atol=1e-3, rtol=1e-3)

    # enabled=False branch of CustomHook.forward: module output only.
    fwd_off = make_hooked_linear(weight, bias, steer, enabled=False)
    out_off = jax.block_until_ready(fwd_off(x))
    ref_off = (jnp.dot(xb, wb.T, precision=jax.lax.Precision.HIGHEST)
               + bias).reshape(B, S, H)
    assert jnp.allclose(out_off, ref_off, atol=1e-3, rtol=1e-3)

    # ---- Test 2: forced K-tiled path, f32 output accumulated in o_ref ------
    B2, S2, H_in2, H_out2 = 4, 16, 384, 256
    x2 = jax.random.normal(kx2, (B2, S2, H_in2), dtype=jnp.float32)
    w2 = jax.random.normal(kw2, (H_out2, H_in2), dtype=jnp.float32) * 0.05
    b2 = jax.random.normal(kb2, (H_out2,), dtype=jnp.float32) * 0.01
    s2 = jax.random.normal(ks2, (H_out2,), dtype=jnp.float32) * 0.1

    fwd2 = make_hooked_linear(w2, b2, s2, enabled=True,
                              tk_target=128, max_fullk_vmem_bytes=0)
    out2 = jax.block_until_ready(fwd2(x2))
    xb2 = x2.astype(jnp.bfloat16).astype(jnp.float32).reshape(-1, H_in2)
    wb2 = w2.astype(jnp.bfloat16).astype(jnp.float32)
    ref2 = (jnp.dot(xb2, wb2.T, precision=jax.lax.Precision.HIGHEST)
            + b2 + s2).reshape(B2, S2, H_out2)
    assert out2.shape == (B2, S2, H_out2)
    assert jnp.allclose(out2, ref2, atol=2e-2, rtol=2e-2)

    # ---- Test 3: bf16 activations/output -> K-tiled + f32 scratch path -----
    x3 = x2.astype(jnp.bfloat16)
    out3 = jax.block_until_ready(fwd2(x3))
    assert out3.dtype == jnp.bfloat16
    assert jnp.allclose(out3.astype(jnp.float32), ref2, atol=6e-2, rtol=6e-2)

    print("KERNEL_OK")
</pallas_src>

<mosaic_0001>
module attributes {stable_mosaic.version = 11 : i64} {
  func.func @_fullk_kernel(%arg0: i32, %arg1: i32, %arg2: memref<16x32xbf16, #tpu.memory_space<vmem>>, %arg3: memref<32x128xbf16, #tpu.memory_space<vmem>>, %arg4: memref<1x128xf32, #tpu.memory_space<vmem>>, %arg5: memref<16x128xf32, #tpu.memory_space<vmem>>) attributes {dimension_semantics = [#tpu.dimension_semantics<parallel>, #tpu.dimension_semantics<parallel>], iteration_bounds = array<i64: 1, 1>, scalar_prefetch = 0 : i64, scratch_operands = 0 : i64, tpu.core_type = #tpu.core_type<tc>, window_params = [{transform_indices = @transform_0, window_bounds = array<i64: 16, 32>}, {transform_indices = @transform_1, window_bounds = array<i64: 32, 128>}, {transform_indices = @transform_2, window_bounds = array<i64: 1, 128>}, {transform_indices = @transform_3, window_bounds = array<i64: 16, 128>}]} {
    %c0 = arith.constant 0 : index
    %c0_0 = arith.constant 0 : index
    %0 = vector.load %arg2[%c0, %c0_0] : memref<16x32xbf16, #tpu.memory_space<vmem>>, vector<16x32xbf16>
    %c0_1 = arith.constant 0 : index
    %c0_2 = arith.constant 0 : index
    %1 = vector.load %arg3[%c0_1, %c0_2] : memref<32x128xbf16, #tpu.memory_space<vmem>>, vector<32x128xbf16>
    %cst = arith.constant dense<0.000000e+00> : vector<16x128xf32>
    %2 = tpu.matmul %0, %1, %cst {dimension_numbers = #tpu.dot_dimension_numbers<[1], [0], [0], [1], [0, 0, 1, 1], [], []>} : vector<16x32xbf16>, vector<32x128xbf16>, vector<16x128xf32> -> vector<16x128xf32>
    %c0_3 = arith.constant 0 : index
    %c0_4 = arith.constant 0 : index
    %3 = vector.load %arg4[%c0_3, %c0_4] : memref<1x128xf32, #tpu.memory_space<vmem>>, vector<1x128xf32>
    %4 = vector.broadcast %3 : vector<1x128xf32> to vector<16x128xf32>
    %5 = arith.addf %2, %4 : vector<16x128xf32>
    %c0_5 = arith.constant 0 : index
    %c0_6 = arith.constant 0 : index
    %6 = vector.load %arg5[%c0_5, %c0_6] : memref<16x128xf32, #tpu.memory_space<vmem>>, vector<16x128xf32>
    tpu.vector_store %arg5[%c0_5, %c0_6], %5 {strides = array<i32>} : memref<16x128xf32, #tpu.memory_space<vmem>>, vector<16x128xf32>,
    return
  }
  func.func @transform_0(%arg0: i32, %arg1: i32) -> (i32, i32) {
    %c0_i32 = arith.constant 0 : i32
    %c0_i32_0 = arith.constant 0 : i32
    return %arg0, %c0_i32 : i32, i32
  }
  func.func @transform_1(%arg0: i32, %arg1: i32) -> (i32, i32) {
    %c0_i32 = arith.constant 0 : i32
    %c0_i32_0 = arith.constant 0 : i32
    return %c0_i32, %arg1 : i32, i32
  }
  func.func @transform_2(%arg0: i32, %arg1: i32) -> (i32, i32) {
    %c0_i32 = arith.constant 0 : i32
    %c0_i32_0 = arith.constant 0 : i32
    return %c0_i32, %arg1 : i32, i32
  }
  func.func @transform_3(%arg0: i32, %arg1: i32) -> (i32, i32) {
    %c0_i32 = arith.constant 0 : i32
    return %arg0, %arg1 : i32, i32
  }
}

</mosaic_0001>

<bundles_post_ra>
// kernel: forward.1
= control target key start
LH: loop header
LB: loop body
LE: loop exit
PB: predicated region body
PF: predicated region fallthrough
CT: control target
= control target key end

     0   :  { %v117_v0 = vmov 0.0   ;;  %vm118_vm0 = vmmov 0   ;;  %vm45_vm1 = vcmask 261120   ;;  %s157_s1 = inlined_call_operand.vmem [shape: bf16[32,128], index: 1, kind: input, shape index: {}]   ;;  %s158_s0 = inlined_call_operand.vmem [shape: bf16[16,32], index: 0, kind: input, shape index: {}]   ;;  %s159_s2 = inlined_call_operand.vmem [shape: f32[1,128], index: 2, kind: input, shape index: {}]   ;;  %s160_s3 = inlined_call_operand.vmem [shape: f32[16,128], index: 3, kind: output, shape index: {}]  }
   0x1   :  { %104 = vmatprep.subr.bf16.mxu0 %v117_v0  ;;  %v114_v1 = vld [vmem:[%s157_s1 + $0x8] sm:$0xff]   ;;  %108 = vmatprep.mubr.msk.bf16.mxu0 %vm118_vm0, %v117_v0  ;;  %v115_v2 = vld [vmem:[%s157_s1] sm:$0xff]  }
   0x2   :  { %105 = vmatpush3.bf16.msra.mxu0 %v114_v1  ;;  %v116_v3 = vld [vmem:[%s158_s0] sm:$0xff]  }
   0x3   :  { %106 = vmatprep.subr.bf16.mxu0 %v117_v0  ;;  %v96_v4 = vld [vmem:[%s159_s2] ss:$0 sm:$0xff] }
   0x6   :  { %107 = vmatpush3.bf16.msra.mxu0 %v115_v2 }
   0x9   :  { %109 = vmatmul.mubr.msk.bf16.vlgmr.msra.gmra.mxu0 %vm45_vm1, %v116_v3 }
  0xc9   :  { %v83_v5 = vpop.f32.mrf.mxu0 }
  0xca   :  { %v84_v6 = vadd.f32 %v96_v4, %v83_v5 }
  0xcb   :  { %v110_v7 = vpop.f32.mrf.mxu0 }
  0xcc   :  { %90 = vst [vmem:[%s160_s3] sm:$0xff] %v84_v6 }
  0xcd   :  { %v86_v8 = vpop.f32.mrf.mxu0 }
  0xce   :  { %v87_v9 = vadd.f32 %v96_v4, %v86_v8 }
  0xcf   :  { %v111_v10 = vpop.f32.mrf.mxu0 }
  0xd0   :  { %91 = vst [vmem:[%s160_s3 + $0x8] sm:$0xff] %v87_v9 }

</bundles_post_ra>
